<compile_context>
chip_gen: v7x
topology: tpu7x:2x2x1
jax: 0.10.0
libtpu: 0.0.40
codegen_flags: <defaults>
</compile_context>

<pallas_src>
import functools
import math

import jax
import jax.numpy as jnp
from jax.experimental import pallas as pl
from jax.experimental.pallas import tpu as pltpu


def _round_up(x, m):
    return ((x + m - 1) // m) * m


# --------------------------------- Pallas kernel ---------------------------------
def _cp_embedding_kernel(ids_ref, table_ref, o_ref, buf_ref, sem, *, scale, tm):
    # ids_ref:   SMEM int32[m_pad]   -- token ids (scalar-prefetched)
    # table_ref: HBM  [V, D]         -- embedding table, stays in HBM
    # o_ref:     VMEM [tm, D]        -- output tile (lane-dense)
    # buf_ref:   VMEM [tm, D]        -- DMA landing buffer
    # sem:       DMA semaphore array (1,)
    base = pl.program_id(0) * tm

    # Issue all row-gather DMAs for this tile (overlapped, single semaphore).
    @pl.loop(0, tm)
    def _(r):
        tok = ids_ref[base + r]
        pltpu.make_async_copy(
            table_ref.at[pl.ds(tok, 1)], buf_ref.at[pl.ds(r, 1)], sem.at[0]
        ).start()

    # Drain: one wait per issued copy (identical sizes, order irrelevant).
    @pl.loop(0, tm)
    def _(r):
        pltpu.make_async_copy(
            table_ref.at[pl.ds(0, 1)], buf_ref.at[pl.ds(r, 1)], sem.at[0]
        ).wait()

    # Fused sqrt(d_model) scale, written lane-dense to the output tile.
    o_ref[...] = (buf_ref[...] * scale).astype(o_ref.dtype)


# ----------------------------------- wrapper --------------------------------------
def cp_embedding(ids, emb_table, *, row_block=512):
    """CPEmbedding.forward: emb_table[ids] * sqrt(d_model), as one fused Pallas call."""
    v, d_model = emb_table.shape
    scale = math.sqrt(d_model)

    orig_shape = ids.shape
    flat_ids = ids.reshape(-1).astype(jnp.int32)
    m = int(flat_ids.shape[0])

    # Row tile: multiple of 8 (sublane); aim for >=2 grid steps (v7x megacore);
    # prefer a tile that divides m exactly (skips pad + post-call slice).
    m8 = _round_up(max(m, 1), 8)
    half = _round_up((m8 + 1) // 2, 8)
    tm = max(8, min(row_block, half))
    if m >= 8 and m % 8 == 0:
        cand = tm
        while cand > 8 and m % cand != 0:
            cand -= 8
        tm = cand
    m_pad = _round_up(max(m, 1), tm)
    if m_pad != m:
        # padded rows gather token 0 and are sliced off below
        flat_ids = jnp.pad(flat_ids, (0, m_pad - m))

    kernel = functools.partial(_cp_embedding_kernel, scale=scale, tm=tm)
    out = pl.pallas_call(
        kernel,
        out_shape=jax.ShapeDtypeStruct((m_pad, d_model), emb_table.dtype),
        grid_spec=pltpu.PrefetchScalarGridSpec(
            num_scalar_prefetch=1,                          # ids -> SMEM
            grid=(m_pad // tm,),
            in_specs=[pl.BlockSpec(memory_space=pl.ANY)],   # table stays in HBM
            out_specs=pl.BlockSpec((tm, d_model), lambda i, ids: (i, 0)),
            scratch_shapes=[
                pltpu.VMEM((tm, d_model), emb_table.dtype),
                pltpu.SemaphoreType.DMA((1,)),
            ],
        ),
        compiler_params=pltpu.CompilerParams(
            dimension_semantics=("parallel",),   # rows independent -> megacore shard
        ),
    )(flat_ids, emb_table)

    if m_pad != m:
        out = out[:m]
    return out.reshape(*orig_shape, d_model)


# -------------------------------------- main ---------------------------------------
if __name__ == "__main__":
    # Small shapes consistent with the CP model usage of CPEmbedding.
    N_TOKEN = 64
    D_MODEL = 128          # lane-dense output width (multiple of 128)
    BATCH = 2
    SEQ = 8

    key = jax.random.PRNGKey(0)
    k_ids, k_emb = jax.random.split(key)

    ids = jax.random.randint(k_ids, (BATCH, SEQ), 0, N_TOKEN, dtype=jnp.int32)
    emb_table = jax.random.normal(k_emb, (N_TOKEN, D_MODEL), dtype=jnp.float32) * 0.02

    out = jax.block_until_ready(cp_embedding(ids, emb_table))

    # sanity check against the plain-JAX reference of the PyTorch forward
    assert out.shape == (BATCH, SEQ, D_MODEL)
    ref = emb_table[ids] * math.sqrt(D_MODEL)
    assert bool(jnp.all(jnp.isfinite(out)))
    assert bool(jnp.allclose(out, ref, atol=1e-5, rtol=1e-5))

    print("KERNEL_OK")
</pallas_src>

<mosaic_0001>
module attributes {stable_mosaic.version = 11 : i64} {
  func.func @_cp_embedding_kernel(%arg0: i32, %arg1: memref<16xi32, #tpu.memory_space<smem>>, %arg2: memref<64x128xf32, #tpu.memory_space<any>>, %arg3: memref<8x128xf32, #tpu.memory_space<vmem>>, %arg4: memref<8x128xf32, #tpu.memory_space<vmem>>, %arg5: memref<1x!tpu.dma_semaphore, #tpu.memory_space<semaphore_mem>>) attributes {dimension_semantics = [#tpu.dimension_semantics<parallel>], iteration_bounds = array<i64: 2>, scalar_prefetch = 1 : i64, scratch_operands = 2 : i64, tpu.core_type = #tpu.core_type<tc>, window_params = [{}, {transform_indices = @transform_1, window_bounds = array<i64: 8, 128>}]} {
    %c8_i32 = arith.constant 8 : i32
    %0 = arith.muli %arg0, %c8_i32 : i32
    %c0_i32 = arith.constant 0 : i32
    %c8_i32_0 = arith.constant 8 : i32
    %1 = arith.addi %c0_i32, %c8_i32_0 : i32
    %c1_i32 = arith.constant 1 : i32
    scf.for %arg6 = %c0_i32 to %1 step %c1_i32  : i32 {
      %c1_i32_9 = arith.constant 1 : i32
      %7 = arith.muli %arg6, %c1_i32_9 : i32
      %c0_i32_10 = arith.constant 0 : i32
      %8 = arith.addi %c0_i32_10, %7 : i32
      %9 = arith.addi %0, %8 : i32
      %10 = arith.index_cast %9 : i32 to index
      %11 = memref.load %arg1[%10] : memref<16xi32, #tpu.memory_space<smem>>
      %c0_i32_11 = arith.constant 0 : i32
      %c0_i32_12 = arith.constant 0 : i32
      %12 = tpu.memref_slice %arg2[%11, %c0_i32_12] : memref<64x128xf32, #tpu.memory_space<any>> -> memref<1x128xf32, #tpu.memory_space<any>>
      %c0_i32_13 = arith.constant 0 : i32
      %13 = tpu.memref_slice %arg4[%8, %c0_i32_13] : memref<8x128xf32, #tpu.memory_space<vmem>> -> memref<1x128xf32, #tpu.memory_space<vmem>>
      %14 = tpu.memref_slice %arg5[%c0_i32_11] : memref<1x!tpu.dma_semaphore, #tpu.memory_space<semaphore_mem>> -> memref<1x!tpu.dma_semaphore, #tpu.memory_space<semaphore_mem>>
      %15 = tpu.memref_squeeze %14 : memref<1x!tpu.dma_semaphore, #tpu.memory_space<semaphore_mem>> -> memref<!tpu.dma_semaphore, #tpu.memory_space<semaphore_mem>>
      tpu.enqueue_dma source(%12 : memref<1x128xf32, #tpu.memory_space<any>>) target(%13 : memref<1x128xf32, #tpu.memory_space<vmem>>) target_semaphore(%15 : memref<!tpu.dma_semaphore, #tpu.memory_space<semaphore_mem>>)
    }
    %c8_i32_1 = arith.constant 8 : i32
    %c0_i32_2 = arith.constant 0 : i32
    %c8_i32_3 = arith.constant 8 : i32
    %2 = arith.addi %c0_i32_2, %c8_i32_3 : i32
    %c1_i32_4 = arith.constant 1 : i32
    scf.for %arg6 = %c0_i32_2 to %2 step %c1_i32_4  : i32 {
      %c1_i32_9 = arith.constant 1 : i32
      %7 = arith.muli %arg6, %c1_i32_9 : i32
      %c0_i32_10 = arith.constant 0 : i32
      %8 = arith.addi %c0_i32_10, %7 : i32
      %c0_i32_11 = arith.constant 0 : i32
      %c0_i32_12 = arith.constant 0 : i32
      %c0_i32_13 = arith.constant 0 : i32
      %9 = tpu.memref_slice %arg2[%c0_i32_12, %c0_i32_13] : memref<64x128xf32, #tpu.memory_space<any>> -> memref<1x128xf32, #tpu.memory_space<any>>
      %c0_i32_14 = arith.constant 0 : i32
      %10 = tpu.memref_slice %arg4[%8, %c0_i32_14] : memref<8x128xf32, #tpu.memory_space<vmem>> -> memref<1x128xf32, #tpu.memory_space<vmem>>
      %11 = tpu.memref_slice %arg5[%c0_i32_11] : memref<1x!tpu.dma_semaphore, #tpu.memory_space<semaphore_mem>> -> memref<1x!tpu.dma_semaphore, #tpu.memory_space<semaphore_mem>>
      %12 = tpu.memref_squeeze %11 : memref<1x!tpu.dma_semaphore, #tpu.memory_space<semaphore_mem>> -> memref<!tpu.dma_semaphore, #tpu.memory_space<semaphore_mem>>
      tpu.wait_dma2 semaphore(%12 : memref<!tpu.dma_semaphore, #tpu.memory_space<semaphore_mem>>) src(%9 : memref<1x128xf32, #tpu.memory_space<any>>) dst(%10 : memref<1x128xf32, #tpu.memory_space<vmem>>)
    }
    %c8_i32_5 = arith.constant 8 : i32
    %c0 = arith.constant 0 : index
    %c0_6 = arith.constant 0 : index
    %3 = vector.load %arg4[%c0, %c0_6] : memref<8x128xf32, #tpu.memory_space<vmem>>, vector<8x128xf32>
    %cst = arith.constant 11.3137083 : f32
    %4 = vector.broadcast %cst : f32 to vector<8x128xf32>
    %5 = arith.mulf %3, %4 : vector<8x128xf32>
    %c0_7 = arith.constant 0 : index
    %c0_8 = arith.constant 0 : index
    %6 = vector.load %arg3[%c0_7, %c0_8] : memref<8x128xf32, #tpu.memory_space<vmem>>, vector<8x128xf32>
    tpu.vector_store %arg3[%c0_7, %c0_8], %5 {strides = array<i32>} : memref<8x128xf32, #tpu.memory_space<vmem>>, vector<8x128xf32>,
    return
  }
  func.func @transform_1(%arg0: i32, %arg1: memref<16xi32, #tpu.memory_space<smem>>) -> (i32, i32) {
    %c0_i32 = arith.constant 0 : i32
    %c0_i32_0 = arith.constant 0 : i32
    return %arg0, %c0_i32 : i32, i32
  }
}

</mosaic_0001>

<bundles_post_ra>
// kernel: tpu_custom_call.1
= control target key start
LH: loop header
LB: loop body
LE: loop exit
PB: predicated region body
PF: predicated region fallthrough
CT: control target
= control target key end

     0   :  { %s476_s0 = inlined_call_operand.hbm [shape: s32[16], index: 0, kind: input, shape index: {}]   ;;  %s477_s1 = inlined_call_operand.hbm [shape: f32[64,128], index: 1, kind: input, shape index: {}]   ;;  %s478_s2 = inlined_call_operand.hbm [shape: f32[16,128], index: 2, kind: output, shape index: {}]  }
   0x1   :  { %s222_s11 = scalar_lea.hbm %s476_s0, 16 }
   0x2   :  { %p223_p0 = scmp.ne.s32.totalorder %s476_s0, %s222_s11  ;;  %p226_p1 = scmp.lt.u32.totalorder %s222_s11, %s476_s0 }
   0x4   :  { %p228_p2 = pnand %p226_p1, %p223_p0 }
   0x6   :  { %231 = shalt.err (!%p228_p2)  }
   0x7   :  { %s332_s16 = smov [#allocation5]  }
   0x8   :  { %8 = dma.hbm_to_smem %s476_s0, 16, %s332_s16, [#allocation4] }
   0x9   :  { %304 = dma.done.wait [#allocation4], 16 }
   0xa   :  { %305 = vsyncadd [#allocation4], 4294967280 }
   0xb   :  { %10 = sfence }
   0xc   :  { %11 = vsyncpa [#allocation7], 0 }
   0xd   :  { %13 = vsyncpa [#allocation7 + $0x1], 0  ;;  %s362_s19 = smov 0   ;;  %s364_s20 = smov 0  }
   0xe   :  { %s366_s21 = smov 0  }
   0xf LB: > { %s163_s0 = sadd.s32 4294967295, %s322_s21   ;;  %s379_s22 = sadd.s32 1, %s322_s21   ;;  %s322_s21 = sphi %s366_s21, %s484_s21   ;;  %s318_s20 = sphi %s364_s20, %s483_s20   ;;  %s314_s19 = sphi %s362_s19, %s482_s19  }
  0x10   : > { %s22_s23 = ssub.s32 %s322_s21, %s379_s22  ;;  %s25_s24 = sadd.s32 1, %s318_s20 }
  0x11   : > { %p23_p3 = scmp.eq.s32.totalorder %s22_s23, 0  ;;  %p164_p4 = scmp.ne.s32.totalorder %s22_s23, 0 }
  0x12   : > { %p29_p5 = scmp.eq.s32.totalorder %s322_s21, 1  ;;  %p34_p6 = scmp.ne.s32.totalorder %s318_s20, %s314_s19 }
  0x13   : > { %s388_s25 = scalar_select %p23_p3, %s318_s20, %s25_s24  }
  0x14   : > { %p390_p7 = por %p164_p4, %p29_p5  ;;  %p35_p8 = scmp.eq.s32.totalorder %s163_s0, 1 }
  0x15   : > { %p165_p10 = scmp.ge.s32.totalorder %s322_s21, 2 }
  0x16   : > { %p394_p9 = por %p35_p8, %p34_p6  ;;  %s49_s28 = sand.u32 (!%p165_p10), 1, %s318_s20  }
  0x17   : > { %44 = sbr.rel (%p165_p10) target bundleno = 98 (0x62), region = 12  ;;  %s167_s29 = sshll.u32 (!%p165_p10), %s322_s21, 3 }
  0x18   : > { %s480_s27 = scalar_select %p394_p9, 1, 0 }
  0x19   : > { %s403_s30 = sshll.u32 (!%p165_p10), %s49_s28, 3  ;;  %s406_s4 = smov (!%p165_p10), 0  }
  0x1a   : > { %s51_s3 = scalar_lea.vmem (!%p165_p10), [#allocation6], %s403_s30 }
  0x1e LB: >> { %s59_s5 = sadd.s32 %s326_s4, %s167_s29  ;;  %s63_s7 = scalar_lea.vmem [#allocation2], %s326_s4  ;;  %s326_s4 = sphi %s406_s4, %s58_s4  }
  0x1f   : >> { %s60_s6 = sld [smem:[#allocation5 + %s59_s5]]  ;;  %s71_s8 = sshll.u32 %s63_s7, 4  ;;  %s72_s8 = int_to_ptr.vmem [resolvable:$true] %s71_s8 }
  0x20   : >> { %s234_s16 = scalar_lea.hbm %s477_s1, 1024 }
  0x25   : >> { %s168_s9 = sshll.u32 %s60_s6, 4 }
  0x26   : >> { %s62_s12 = scalar_lea.hbm %s477_s1, %s168_s9 }
  0x27   : >> { %s232_s13 = scalar_lea.hbm %s62_s12, 16  ;;  %p235_p12 = scmp.lt.u32.totalorder %s62_s12, %s477_s1 }
  0x28   : >> { %p233_p11 = scmp.ne.s32.totalorder %s62_s12, %s232_s13  ;;  %p236_p13 = scmp.lt.u32.totalorder %s234_s16, %s232_s13 }
  0x29   : >> { %p238_p1 = scmp.lt.u32.totalorder %s232_s13, %s62_s12 }
  0x2a   : >> { %p237_p0 = por %p236_p13, %p235_p12 }
  0x2c   : >> { %p239_p2 = por %p238_p1, %p237_p0 }
  0x2e   : >> { %p240_p3 = pnand %p239_p2, %p233_p11 }
  0x30   : >> { %243 = shalt.err (!%p240_p3)  }
  0x31   : >> { %s244_s0 = scalar_lea.vmem %s72_s8, 16  ;;  %s333_s23 = smov [#allocation2]  }
  0x32   : >> { %p245_p4 = scmp.ne.s32.totalorder %s72_s8, %s244_s0  ;;  %s246_s24 = sshll.u32 %s333_s23, 4  ;;  %s247_s24 = int_to_ptr.vmem [resolvable:$false] %s246_s24 }
  0x33   : >> { %s248_s5 = scalar_lea.vmem %s247_s24, 128  ;;  %p249_p5 = scmp.lt.s32.totalorder %s72_s8, %s247_s24 }
  0x34   : >> { %p250_p6 = scmp.lt.s32.totalorder %s248_s5, %s244_s0 }
  0x36   : >> { %p251_p8 = por %p250_p6, %p249_p5 }
  0x38   : >> { %p252_p10 = pnand %p251_p8, %p245_p4 }
  0x3a   : >> { %255 = shalt.err (!%p252_p10)  }
  0x3b   : >> { %74 = dma.hbm_to_vmem [thread:$0]  %s62_s12, 16, %s72_s8, [#allocation3] }
  0x3c   : >> { %s58_s4 = sadd.s32 1, %s326_s4  }
  0x3d   : >> { %p55_p9 = scmp.ge.s32.totalorder %s58_s4, 8  }
  0x3e   : > { %s328_s6 = smov (%p55_p9), 0  }
  0x3f   : > { %57 = sbr.rel (!%p55_p9) target bundleno = 30 (0x1e), region = 64 }
  0x46 LB: >> { %306 = dma.done.wait [#allocation3], 16  ;;  %s330_s6 = sphi %s328_s6, %s80_s6  }
  0x47   : >> { %307 = vsyncadd [#allocation3], 4294967280  ;;  %s80_s6 = sadd.s32 1, %s330_s6  }
  0x48   : >> { %p77_p11 = scmp.ge.s32.totalorder %s80_s6, 8  }
  0x49   : > { %v84_v0 = vld [vmem:[#allocation2] sm:$0xff] (%p77_p11)  ;;  %s170_s7 = sshll.u32 (%p77_p11), %s322_s21, 7  ;;  %s101_s9 = sshll.u32 (%p77_p11), %s51_s3, 4  ;;  %s435_s9 = int_to_ptr.vmem [resolvable:$true] %s101_s9 }
  0x4a   : > { %79 = sbr.rel (!%p77_p11) target bundleno = 70 (0x46), region = 75  ;;  %v85_v1 = vmul.f32 (%p77_p11), 11.313708, %v84_v0  ;;  %s431_s29 = scalar_lea.hbm (%p77_p11), %s478_s2, %s170_s7 }
  0x4b   : > { %s88_s10 = scalar_lea.sflag (%p77_p11), [#allocation7], %s49_s28  ;;  %s256_s11 = scalar_lea.vmem (%p77_p11), %s435_s9, 128 }
  0x4c   : > { %86 = vst [vmem:[%s51_s3] sm:$0xff] (%p77_p11), %v85_v1  ;;  %p257_p9 = scmp.ne.s32.totalorder (%p77_p11), %s435_s9, %s256_s11  ;;  %s334_s12 = smov (%p77_p11), [#allocation6]  }
  0x4d   : > { %s260_s13 = sshll.u32 (%p77_p11), %s334_s12, 4  ;;  %s261_s13 = int_to_ptr.vmem [resolvable:$false] %s260_s13 }
  0x4e   : > { %p258_p12 = pnand (%p77_p11), %p257_p9, %p390_p7  ;;  %s262_s14 = scalar_lea.vmem (%p77_p11), %s261_s13, 256 }
  0x4f   : > { %p263_p0 = scmp.lt.s32.totalorder (%p77_p11), %s435_s9, %s261_s13  ;;  %p264_p1 = scmp.lt.s32.totalorder (%p77_p11), %s262_s14, %s256_s11 }
  0x50   : > { %p259_p13 = pneg (%p77_p11), %p258_p12 }
  0x51   : > { %p265_p2 = por %p264_p1, %p263_p0 }
  0x53   : > { %p266_p3 = pnand %p265_p2, %p259_p13 }
  0x55   : > { %269 = shalt.err (!%p266_p3)
}
  0x56   : > { %s270_s28 = scalar_lea.hbm %s431_s29, 128  ;;  %s274_s15 = scalar_lea.hbm %s478_s2, 256 }
  0x57   : > { %p271_p4 = scmp.ne.s32.totalorder %s431_s29, %s270_s28  ;;  %p275_p8 = scmp.lt.u32.totalorder %s431_s29, %s478_s2 }
  0x58   : > { %p276_p10 = scmp.lt.u32.totalorder %s274_s15, %s270_s28  ;;  %p278_p9 = scmp.lt.u32.totalorder %s270_s28, %s431_s29 }
  0x59   : > { %p272_p5 = pnand %p271_p4, %p390_p7 }
  0x5a   : > { %p277_p11 = por %p276_p10, %p275_p8 }
  0x5b   : > { %p273_p6 = pneg %p272_p5 }
  0x5c   : > { %p279_p12 = por %p278_p9, %p277_p11 }
  0x5e   : > { %p280_p13 = pnand %p279_p12, %p273_p6 }
  0x60   : > { %283 = shalt.err (!%p280_p13)
}
  0x61   : > { %174 = dma.vmem_to_hbm [thread:$0]  (%p390_p7), %s435_s9, 128, %s431_s29, %s88_s10  }
  0x62 PF: > { %p180_p0 = scmp.ge.s32.totalorder %s322_s21, 1  ;;  %s113_s18 = sand.u32 1, %s314_s19  }
  0x63   : > { %p481_p1 = scmp.ne.s32.totalorder %s480_s27, 0  ;;  %s114_s0 = scalar_lea.sflag [#allocation7], %s113_s18 }
  0x65   : > { %p177_p2 = pnand %p180_p0, %p481_p1 }
  0x67   : > { %309 = dma.done.wait (!%p177_p2), %s114_s0, 128  }
  0x68   : > { %311 = vsyncadd (!%p177_p2), %s114_s0, 4294967168  ;;  %p16_p3 = scmp.ge.s32.totalorder %s379_s22, 3   ;;  %s482_s19 = smov %s318_s20 }
  0x69   : > { %s483_s20 = smov %s388_s25  ;;  %s484_s21 = smov %s379_s22 }
  0x6a   :  { %18 = sbr.rel (!%p16_p3) target bundleno = 15 (0xf), region = 86 }
  0x71   :  { %119 = vsyncpa [#allocation7], 1 }
  0x72   :  { %121 = vsyncpa [#allocation7 + $0x1], 1 }
  0x73   :  { %122 = vsyncmov [#allocation3] }
  0x76   :  { %s123_s21 = vpop.sfrf %122 }
  0x77   :  { %p173_p7 = scmp.ne.s32.totalorder %s123_s21, 0 }
  0x79   :  { %127 = shalt.err (%p173_p7)  }

</bundles_post_ra>
